<compile_context>
chip_gen: v7x
topology: tpu7x:2x2x1
jax: 0.10.0
libtpu: 0.0.40
codegen_flags: <defaults>
</compile_context>

<pallas_src>
import jax
import jax.numpy as jnp
from jax.experimental import pallas as pl
from jax.experimental.pallas import tpu as pltpu

HIDDEN = 256   # fixed by the module definition (Linear(in_dim, 256))
LANE = 128     # TPU lane width


def _round_up(x, m):
    return ((x + m - 1) // m) * m


def _cdiv(a, b):
    return (a + b - 1) // b


def _vmem_capacity_bytes():
    try:
        return int(pltpu.get_tpu_info().vmem_capacity_bytes)
    except Exception:
        return 64 * 1024 * 1024  # conservative (v7x-sized) default if the query is unavailable


def _supports_pipeline_mode():
    # Pure-Python constructor probe; narrow feature detect instead of a broad runtime except.
    try:
        pl.BlockSpec((8, LANE), lambda i: (0, 0), pipeline_mode=pl.Buffered(1))
        return True
    except (AttributeError, TypeError):
        return False


def _mlp_kernel(x_ref, w1_ref, b1_ref, w2_ref, b2_ref, o_ref):
    # Cast x to bf16 in-kernel (VPU, hidden under the x-tile DMA) instead of a wrapper pre-pass.
    x = x_ref[...].astype(jnp.bfloat16)
    # matmul 1: (tb, in_dim) @ (in_dim, 256) -> f32 accumulate on the MXU
    h = jnp.dot(x, w1_ref[...], preferred_element_type=jnp.float32)
    h = jnp.maximum(h + b1_ref[...], 0.0)                      # bias + ReLU in f32
    # matmul 2: (tb, 256) @ (256, hid_pad) -> f32 accumulate
    y = jnp.dot(h.astype(jnp.bfloat16), w2_ref[...],
                preferred_element_type=jnp.float32)
    o_ref[...] = (y + b2_ref[...]).astype(o_ref.dtype)


def _pick_tiling(batch, in_dim, hid_pad, out_bytes):
    """Pick (tb, n_steps, B_pad, vmem_limit) with generation-aware VMEM budgeting."""
    vmem_cap = _vmem_capacity_bytes()
    if vmem_cap >= 120 * 1024 * 1024:
        # 128 MiB VMEM parts (v5e / v6e / v5p): use most of it, single TensorCore.
        budget, vmem_limit, dual_tc = 88 * 1024 * 1024, 100 * 1024 * 1024, False
    else:
        # 64 MiB-per-TensorCore parts (v7x) or unknown: tight budget, two TensorCores.
        budget, vmem_limit, dual_tc = 36 * 1024 * 1024, 46 * 1024 * 1024, True

    # Resident weights / biases (bf16 weights, f32 biases), single-buffered.
    fixed = (in_dim * HIDDEN * 2 + HIDDEN * hid_pad * 2
             + HIDDEN * 4 + hid_pad * 4)

    def needed(tb):
        x_tiles = 2 * tb * in_dim * 4                              # double-buffered f32 x tile
        out_tiles = 2 * tb * hid_pad * out_bytes                   # double-buffered out tile
        inter = tb * (HIDDEN * 4 + HIDDEN * 2 + hid_pad * 4)       # h f32 + h bf16 + y f32
        return fixed + x_tiles + out_tiles + inter

    tb_max = 2048
    while tb_max > 16 and needed(tb_max) > budget:
        tb_max //= 2
    # TODO(synk): for in_dim so large that even tb=16 exceeds the budget, add a K grid axis
    # over in_dim with an f32 accumulator (pl.when init/finalize) instead of a full x tile.

    n_steps = max(_cdiv(batch, tb_max), 1)
    if dual_tc and batch >= 512:
        n_steps = max(n_steps, 2)     # ensure the "parallel" axis splits across both TCs on v7x
    tb = _round_up(_cdiv(batch, n_steps), 16)   # sublane-aligned, <= tb_max, < 16 rows padding/step
    b_pad = n_steps * tb
    return tb, n_steps, b_pad, vmem_limit


def mlp_forward(x, w1, b1, w2, b2, *, out_dtype=jnp.float32):
    """x: [B, in_dim] f32; w1: [in_dim, 256]; b1: [256]; w2: [256, hid]; b2: [hid].
    Returns [B, hid] = ReLU(x @ w1 + b1) @ w2 + b2 (bf16 MXU operands, f32 accumulate).
    Set out_dtype=jnp.bfloat16 to halve the output HBM stream when the consumer allows it."""
    B, in_dim = x.shape
    hid_dim = w2.shape[1]
    hid_pad = _round_up(hid_dim, LANE)          # lane-dense output stores
    out_bytes = jnp.dtype(out_dtype).itemsize

    tb, n_steps, B_pad, vmem_limit = _pick_tiling(B, in_dim, hid_pad, out_bytes)

    # Only pad the batch when actually needed; x keeps its dtype (cast happens in-kernel).
    x_p = x if B_pad == B else jnp.pad(x, ((0, B_pad - B), (0, 0)))
    w1_b = w1.astype(jnp.bfloat16)
    w2_b = jnp.pad(w2, ((0, 0), (0, hid_pad - hid_dim))).astype(jnp.bfloat16)
    b1_2d = b1.reshape(1, HIDDEN).astype(jnp.float32)
    b2_2d = jnp.pad(b2, (0, hid_pad - hid_dim)).reshape(1, hid_pad).astype(jnp.float32)

    flops = 2 * B_pad * (in_dim * HIDDEN + HIDDEN * hid_pad)
    bytes_accessed = (x_p.size * x_p.dtype.itemsize + w1_b.size * 2 + w2_b.size * 2
                      + b1_2d.size * 4 + b2_2d.size * 4 + B_pad * hid_pad * out_bytes)

    # Resident operands (constant index_map): single-buffer when supported to free VMEM.
    resident = dict(pipeline_mode=pl.Buffered(1)) if _supports_pipeline_mode() else {}
    in_specs = [
        pl.BlockSpec((tb, in_dim), lambda i: (i, 0)),                  # x tile (streamed)
        pl.BlockSpec((in_dim, HIDDEN), lambda i: (0, 0), **resident),  # W1 (resident)
        pl.BlockSpec((1, HIDDEN), lambda i: (0, 0), **resident),       # b1
        pl.BlockSpec((HIDDEN, hid_pad), lambda i: (0, 0), **resident), # W2 (resident)
        pl.BlockSpec((1, hid_pad), lambda i: (0, 0), **resident),      # b2
    ]

    out = pl.pallas_call(
        _mlp_kernel,
        out_shape=jax.ShapeDtypeStruct((B_pad, hid_pad), out_dtype),
        grid_spec=pltpu.PrefetchScalarGridSpec(
            num_scalar_prefetch=0,
            grid=(n_steps,),
            in_specs=in_specs,
            out_specs=pl.BlockSpec((tb, hid_pad), lambda i: (i, 0)),
        ),
        compiler_params=pltpu.CompilerParams(
            dimension_semantics=("parallel",),
            vmem_limit_bytes=vmem_limit,
        ),
        cost_estimate=pl.CostEstimate(
            flops=flops, transcendentals=0, bytes_accessed=bytes_accessed),
    )(x_p, w1_b, b1_2d, w2_b, b2_2d)

    if B_pad == B and hid_pad == hid_dim:
        return out                       # no padding -> skip the extra read+write slice pass
    return out[:B, :hid_dim]


def _torch_linear_init(key, fan_in, fan_out):
    """Deterministic init matching torch.nn.Linear's default (uniform +/- 1/sqrt(fan_in))."""
    kw, kb = jax.random.split(key)
    bound = 1.0 / jnp.sqrt(fan_in)
    w = jax.random.uniform(kw, (fan_in, fan_out), jnp.float32, -bound, bound)
    b = jax.random.uniform(kb, (fan_out,), jnp.float32, -bound, bound)
    return w, b


if __name__ == "__main__":
    in_dim, hid_dim = 32, 32
    batch = 8

    key = jax.random.PRNGKey(0)
    k_x, k_l1, k_l2 = jax.random.split(key, 3)

    x = jax.random.normal(k_x, (batch, in_dim), jnp.float32)
    w1, b1 = _torch_linear_init(k_l1, in_dim, HIDDEN)
    w2, b2 = _torch_linear_init(k_l2, HIDDEN, hid_dim)

    out = mlp_forward(x, w1, b1, w2, b2)
    out = jax.block_until_ready(out)
    assert out.shape == (batch, hid_dim)
    assert out.dtype == jnp.float32

    # Reference with the same bf16-MXU-operand / f32-accumulate recipe.
    xb, w1b, w2b = (t.astype(jnp.bfloat16) for t in (x, w1, w2))
    h_ref = jnp.maximum(jnp.dot(xb, w1b, preferred_element_type=jnp.float32) + b1, 0.0)
    ref = jnp.dot(h_ref.astype(jnp.bfloat16), w2b, preferred_element_type=jnp.float32) + b2
    assert jnp.allclose(out, ref, atol=2e-2, rtol=2e-2)

    # Loose sanity check vs the full-f32 reference (bf16 MXU operands -> looser tolerance).
    ref32 = jnp.maximum(x @ w1 + b1, 0.0) @ w2 + b2
    assert jnp.allclose(out, ref32, atol=1e-1, rtol=1e-1)

    print("KERNEL_OK")
</pallas_src>

<mosaic_0001>
module attributes {stable_mosaic.version = 11 : i64} {
  func.func @_mlp_kernel(%arg0: i32, %arg1: memref<16x32xf32, #tpu.memory_space<vmem>>, %arg2: memref<32x256xbf16, #tpu.memory_space<vmem>>, %arg3: memref<1x256xf32, #tpu.memory_space<vmem>>, %arg4: memref<256x128xbf16, #tpu.memory_space<vmem>>, %arg5: memref<1x128xf32, #tpu.memory_space<vmem>>, %arg6: memref<16x128xf32, #tpu.memory_space<vmem>>) attributes {dimension_semantics = [#tpu.dimension_semantics<parallel>], iteration_bounds = array<i64: 1>, scalar_prefetch = 0 : i64, scratch_operands = 0 : i64, tpu.core_type = #tpu.core_type<tc>, window_params = [{transform_indices = @transform_0, window_bounds = array<i64: 16, 32>}, {pipeline_mode = #tpu.pipeline_mode<synchronous>, transform_indices = @transform_1, window_bounds = array<i64: 32, 256>}, {pipeline_mode = #tpu.pipeline_mode<synchronous>, transform_indices = @transform_2, window_bounds = array<i64: 1, 256>}, {pipeline_mode = #tpu.pipeline_mode<synchronous>, transform_indices = @transform_3, window_bounds = array<i64: 256, 128>}, {pipeline_mode = #tpu.pipeline_mode<synchronous>, transform_indices = @transform_4, window_bounds = array<i64: 1, 128>}, {transform_indices = @transform_5, window_bounds = array<i64: 16, 128>}]} {
    %c0 = arith.constant 0 : index
    %c0_0 = arith.constant 0 : index
    %0 = vector.load %arg1[%c0, %c0_0] : memref<16x32xf32, #tpu.memory_space<vmem>>, vector<16x32xf32>
    %1 = arith.truncf %0 : vector<16x32xf32> to vector<16x32xbf16>
    %c0_1 = arith.constant 0 : index
    %c0_2 = arith.constant 0 : index
    %2 = vector.load %arg2[%c0_1, %c0_2] : memref<32x256xbf16, #tpu.memory_space<vmem>>, vector<32x256xbf16>
    %cst = arith.constant dense<0.000000e+00> : vector<16x256xf32>
    %3 = tpu.matmul %1, %2, %cst {dimension_numbers = #tpu.dot_dimension_numbers<[1], [0], [0], [1], [0, 0, 1, 1], [], []>} : vector<16x32xbf16>, vector<32x256xbf16>, vector<16x256xf32> -> vector<16x256xf32>
    %c0_3 = arith.constant 0 : index
    %c0_4 = arith.constant 0 : index
    %4 = vector.load %arg3[%c0_3, %c0_4] : memref<1x256xf32, #tpu.memory_space<vmem>>, vector<1x256xf32>
    %5 = vector.broadcast %4 : vector<1x256xf32> to vector<16x256xf32>
    %6 = arith.addf %3, %5 : vector<16x256xf32>
    %cst_5 = arith.constant 0.000000e+00 : f32
    %7 = vector.broadcast %cst_5 : f32 to vector<16x256xf32>
    %8 = arith.maximumf %6, %7 : vector<16x256xf32>
    %9 = arith.truncf %8 : vector<16x256xf32> to vector<16x256xbf16>
    %c0_6 = arith.constant 0 : index
    %c0_7 = arith.constant 0 : index
    %10 = vector.load %arg4[%c0_6, %c0_7] : memref<256x128xbf16, #tpu.memory_space<vmem>>, vector<256x128xbf16>
    %cst_8 = arith.constant dense<0.000000e+00> : vector<16x128xf32>
    %11 = tpu.matmul %9, %10, %cst_8 {dimension_numbers = #tpu.dot_dimension_numbers<[1], [0], [0], [1], [0, 0, 1, 1], [], []>} : vector<16x256xbf16>, vector<256x128xbf16>, vector<16x128xf32> -> vector<16x128xf32>
    %c0_9 = arith.constant 0 : index
    %c0_10 = arith.constant 0 : index
    %12 = vector.load %arg5[%c0_9, %c0_10] : memref<1x128xf32, #tpu.memory_space<vmem>>, vector<1x128xf32>
    %13 = vector.broadcast %12 : vector<1x128xf32> to vector<16x128xf32>
    %14 = arith.addf %11, %13 : vector<16x128xf32>
    %c0_11 = arith.constant 0 : index
    %c0_12 = arith.constant 0 : index
    %15 = vector.load %arg6[%c0_11, %c0_12] : memref<16x128xf32, #tpu.memory_space<vmem>>, vector<16x128xf32>
    tpu.vector_store %arg6[%c0_11, %c0_12], %14 {strides = array<i32>} : memref<16x128xf32, #tpu.memory_space<vmem>>, vector<16x128xf32>,
    return
  }
  func.func @transform_0(%arg0: i32) -> (i32, i32) {
    %c0_i32 = arith.constant 0 : i32
    %c0_i32_0 = arith.constant 0 : i32
    return %arg0, %c0_i32 : i32, i32
  }
  func.func @transform_1(%arg0: i32) -> (i32, i32) {
    %c0_i32 = arith.constant 0 : i32
    %c0_i32_0 = arith.constant 0 : i32
    %c0_i32_1 = arith.constant 0 : i32
    return %c0_i32, %c0_i32_0 : i32, i32
  }
  func.func @transform_2(%arg0: i32) -> (i32, i32) {
    %c0_i32 = arith.constant 0 : i32
    %c0_i32_0 = arith.constant 0 : i32
    %c0_i32_1 = arith.constant 0 : i32
    return %c0_i32, %c0_i32_0 : i32, i32
  }
  func.func @transform_3(%arg0: i32) -> (i32, i32) {
    %c0_i32 = arith.constant 0 : i32
    %c0_i32_0 = arith.constant 0 : i32
    %c0_i32_1 = arith.constant 0 : i32
    return %c0_i32, %c0_i32_0 : i32, i32
  }
  func.func @transform_4(%arg0: i32) -> (i32, i32) {
    %c0_i32 = arith.constant 0 : i32
    %c0_i32_0 = arith.constant 0 : i32
    %c0_i32_1 = arith.constant 0 : i32
    return %c0_i32, %c0_i32_0 : i32, i32
  }
  func.func @transform_5(%arg0: i32) -> (i32, i32) {
    %c0_i32 = arith.constant 0 : i32
    %c0_i32_0 = arith.constant 0 : i32
    return %arg0, %c0_i32 : i32, i32
  }
}

</mosaic_0001>

<bundles_post_ra>
// kernel: tpu_custom_call.1
= control target key start
LH: loop header
LB: loop body
LE: loop exit
PB: predicated region body
PF: predicated region fallthrough
CT: control target
= control target key end

     0   :  { %10 = vsyncpa [#allocation3], 0  ;;  %s629_s0 = inlined_call_operand.hbm [shape: f32[16,32], index: 0, kind: input, shape index: {}]   ;;  %s630_s1 = inlined_call_operand.hbm [shape: bf16[32,256], index: 1, kind: input, shape index: {}]   ;;  %s631_s2 = inlined_call_operand.vmem [shape: f32[1,256], index: 2, kind: input, shape index: {}]   ;;  %s632_s3 = inlined_call_operand.hbm [shape: bf16[256,128], index: 3, kind: input, shape index: {}]   ;;  %s633_s4 = inlined_call_operand.vmem [shape: f32[1,128], index: 4, kind: input, shape index: {}]   ;;  %s634_s5 = inlined_call_operand.hbm [shape: f32[16,128], index: 5, kind: output, shape index: {}]  }
   0x1   :  { %11 = vsyncpa [#allocation6], 0 }
   0x2   :  { %12 = vsyncpa [#allocation4], 0  ;;  %s520_s18 = smov [#allocation5]   ;;  %s521_s20 = smov [#allocation2]  }
   0x3   :  { %s30_s19 = sshll.u32 %s520_s18, 4  ;;  %s18_s21 = sshll.u32 %s521_s20, 4  ;;  %s31_s19 = int_to_ptr.vmem [resolvable:$true] %s30_s19  ;;  %s559_s21 = int_to_ptr.vmem [resolvable:$true] %s18_s21 }
   0x4   :  { %s426_s24 = scalar_lea.hbm %s630_s1, 512 }
   0x5   :  { %p427_p0 = scmp.ne.s32.totalorder %s630_s1, %s426_s24  ;;  %p430_p1 = scmp.lt.u32.totalorder %s426_s24, %s630_s1 }
   0x7   :  { %p432_p2 = pnand %p430_p1, %p427_p0 }
   0x9   :  { %435 = shalt.err (!%p432_p2)
}
   0xa   :  { %s436_s29 = scalar_lea.vmem %s31_s19, 512  ;;  %p441_p4 = scmp.lt.s32.totalorder %s31_s19, %s31_s19 }
   0xb   :  { %p437_p3 = scmp.ne.s32.totalorder %s31_s19, %s436_s29  ;;  %p442_p5 = scmp.lt.s32.totalorder %s436_s29, %s436_s29 }
   0xd   :  { %p443_p6 = por %p442_p5, %p441_p4 }
   0xf   :  { %p444_p7 = pnand %p443_p6, %p437_p3 }
  0x11   :  { %447 = shalt.err (!%p444_p7)
}
  0x12   :  { %s522_s30 = smov 128   ;;  %s523_s6 = smov 8  }
  0x13   :  { %36 = dma.hbm_to_vmem [thread:$0]  %s630_s1, 512, %s31_s19, [#allocation6], %s522_s30, %s522_s30, %s523_s6  }
  0x14   :  { %s448_s11 = scalar_lea.hbm %s629_s0, 256 }
  0x15   :  { %p449_p8 = scmp.ne.s32.totalorder %s629_s0, %s448_s11  ;;  %p452_p9 = scmp.lt.u32.totalorder %s448_s11, %s629_s0 }
  0x17   :  { %p454_p10 = pnand %p452_p9, %p449_p8 }
  0x19   :  { %457 = shalt.err (!%p454_p10)
}
  0x1a   :  { %s458_s16 = scalar_lea.vmem %s559_s21, 256  ;;  %p463_p12 = scmp.lt.s32.totalorder %s559_s21, %s559_s21 }
  0x1b   :  { %p459_p11 = scmp.ne.s32.totalorder %s559_s21, %s458_s16  ;;  %p464_p13 = scmp.lt.s32.totalorder %s458_s16, %s458_s16 }
  0x1d   :  { %p465_p0 = por %p464_p13, %p463_p12 }
  0x1f   :  { %p466_p1 = pnand %p465_p0, %p459_p11 }
  0x21   :  { %469 = shalt.err (!%p466_p1)
}
  0x22   :  { %24 = dma.hbm_to_vmem [thread:$0]  %s629_s0, 256, %s559_s21, [#allocation3], %s522_s30, %s522_s30, %s523_s6  }
  0x23   :  { %s524_s18 = smov [#allocation7]   ;;  %s470_s23 = scalar_lea.hbm %s632_s3, 2048 }
  0x24   :  { %s44_s19 = sshll.u32 %s524_s18, 4  ;;  %p471_p2 = scmp.ne.s32.totalorder %s632_s3, %s470_s23  ;;  %s45_s19 = int_to_ptr.vmem [resolvable:$true] %s44_s19 }
  0x25   :  { %p474_p3 = scmp.lt.u32.totalorder %s470_s23, %s632_s3 }
  0x27   :  { %p476_p4 = pnand %p474_p3, %p471_p2 }
  0x29   :  { %479 = shalt.err (!%p476_p4)
}
  0x2a   :  { %s480_s28 = scalar_lea.vmem %s45_s19, 2048  ;;  %p485_p6 = scmp.lt.s32.totalorder %s45_s19, %s45_s19 }
  0x2b   :  { %p481_p5 = scmp.ne.s32.totalorder %s45_s19, %s480_s28  ;;  %p486_p7 = scmp.lt.s32.totalorder %s480_s28, %s480_s28 }
  0x2d   :  { %p487_p8 = por %p486_p7, %p485_p6 }
  0x2f   :  { %p488_p9 = pnand %p487_p8, %p481_p5 }
  0x31   :  { %491 = shalt.err (!%p488_p9)
}
  0x32   :  { %s525_s0 = smov 64   ;;  %s526_s21 = smov 4  }
  0x33   :  { %50 = dma.hbm_to_vmem [thread:$0]  %s632_s3, 2048, %s45_s19, [#allocation6], %s525_s0, %s525_s0, %s526_s21  }
  0x34   :  { %514 = dma.done.wait [#allocation3], 256  }
  0x35   :  { %515 = vsyncadd [#allocation3], 4294967040 }
  0x36   :  { %516 = dma.done.wait [#allocation6], 2560  }
  0x37   :  { %517 = vsyncadd [#allocation6], 4294964736  ;;  %v527_v0 = vmov 0   ;;  %v404_v1 = vld [vmem:[#allocation5 + $0x4] ss:$8 sps:$4 sm:$0xff]   ;;  %v63_v5 = vld [vmem:[#allocation2] sm:$0xff]  ;;  %v72_v24 = vlaneseq }
  0x38   :  { %138 = vmatprep.mubr.bf16.mxu0 %v527_v0  ;;  %v406_v2 = vld [vmem:[#allocation5] ss:$8 sps:$4 sm:$0xff]   ;;  %106 = vmatprep.subr.bf16.mxu0 %v404_v1  ;;  %v407_v3 = vld [vmem:[#allocation5 + $0x14] ss:$8 sps:$4 sm:$0xff]   ;;  %v409_v4 = vld [vmem:[#allocation5 + $0x10] ss:$8 sps:$4 sm:$0xff]  }
  0x39   :  { %107 = vmatpush1.bf16.msra.mxu0 %v406_v2  ;;  %v64_v6 = vld [vmem:[#allocation2 + $0x8] sm:$0xff]  ;;  %v410_v7 = vld [vmem:[#allocation7 + $0x40] sm:$0xff]   ;;  %v412_v10 = vld [vmem:[#allocation7 + $0x48] sm:$0xff]   ;;  %vm102_vm0 = vcmask 261120   ;;  %v73_v25 = vshrl.u32 %v72_v24, 7  ;;  %s528_s10 = smov [#allocation8]  }
  0x3a   :  { %108 = vmatprep.subr.bf16.mxu0 %v407_v3  ;;  %v411_v8 = vld [vmem:[#allocation7] sm:$0xff]   ;;  %v65_v9 = vpack.c.bf16 %v64_v6, %v63_v5  ;;  %373 = vmatprep.subr.bf16.mxu1 %v410_v7  ;;  %v413_v11 = vld [vmem:[#allocation7 + $0x8] sm:$0xff]   ;;  %v414_v12 = vld [vmem:[#allocation7 + $0x50] sm:$0xff]   ;;  %s338_s11 = sshll.u32 %s528_s10, 4  ;;  %s339_s11 = int_to_ptr.vmem [resolvable:$true] %s338_s11 }
  0x3b   :  { %374 = vmatpush3.bf16.msra.mxu1 %v411_v8  ;;  %v415_v13 = vld [vmem:[#allocation7 + $0x10] sm:$0xff]   ;;  %v416_v14 = vld [vmem:[#allocation7 + $0x58] sm:$0xff]   ;;  %v418_v16 = vld [vmem:[#allocation7 + $0x60] sm:$0xff]   ;;  %v74_v26 = vsub.s32 0, %v73_v25  ;;  %v78_v28 = vsub.s32 1, %v73_v25  ;;  %s492_s12 = scalar_lea.vmem %s339_s11, 256  ;;  %p497_p11 = scmp.lt.s32.totalorder %s339_s11, %s339_s11 }
  0x3c   :  { %375 = vmatprep.subr.bf16.mxu1 %v412_v10  ;;  %v417_v15 = vld [vmem:[#allocation7 + $0x18] sm:$0xff]   ;;  %v419_v17 = vld [vmem:[#allocation7 + $0x20] sm:$0xff]   ;;  %v420_v18 = vld [vmem:[#allocation7 + $0x68] sm:$0xff]   ;;  %p493_p10 = scmp.ne.s32.totalorder %s339_s11, %s492_s12  ;;  %p498_p12 = scmp.lt.s32.totalorder %s492_s12, %s492_s12 }
  0x3d   :  { %109 = vmatpush1.bf16.msra.mxu0 %v409_v4  ;;  %v421_v19 = vld [vmem:[#allocation7 + $0x28] sm:$0xff]   ;;  %v422_v20 = vld [vmem:[#allocation7 + $0x70] sm:$0xff]   ;;  %v424_v22 = vld [vmem:[#allocation7 + $0x78] sm:$0xff]  }
  0x3e   :  { %v423_v21 = vld [vmem:[#allocation7 + $0x30] sm:$0xff]   ;;  %v425_v23 = vld [vmem:[#allocation7 + $0x38] sm:$0xff]   ;;  %p499_p13 = por %p498_p12, %p497_p11 }
  0x3f   :  { %376 = vmatpush3.bf16.msra.mxu1 %v413_v11  ;;  %v70_v27 = vld [vmem:[%s631_s2] sm:$0x3] }
  0x40   :  { %355 = vmatmul.mubr.msk.bf16.vlgmr.msra.gmra.mrb[0].mxu0 %vm102_vm0, %v65_v9  ;;  %377 = vmatprep.subr.bf16.mxu1 %v414_v12  ;;  %v75_v29 = vrot.slane %v70_v27, %v74_v26  ;;  %v79_v30 = vrot.slane %v70_v27, %v78_v28  ;;  %v356_v46 = vld [vmem:[%s633_s4] ss:$0 sm:$0xff]  ;;  %p500_p0 = pnand %p499_p13, %p493_p10 }
  0x43   :  { %378 = vmatpush3.bf16.msra.mxu1 %v415_v13 }
  0x44   :  { %379 = vmatprep.subr.bf16.mxu1 %v416_v14 }
  0x47   :  { %380 = vmatpush3.bf16.msra.mxu1 %v417_v15 }
  0x48   :  { %381 = vmatprep.subr.bf16.mxu1 %v418_v16 }
  0x4b   :  { %382 = vmatpush3.bf16.msra.mxu1 %v419_v17 }
  0x4c   :  { %383 = vmatprep.subr.bf16.mxu1 %v420_v18 }
  0x4f   :  { %384 = vmatpush3.bf16.msra.mxu1 %v421_v19 }
  0x50   :  { %385 = vmatprep.subr.bf16.mxu1 %v422_v20 }
  0x53   :  { %386 = vmatpush3.bf16.msra.mxu1 %v423_v21 }
  0x54   :  { %387 = vmatprep.subr.bf16.mxu1 %v424_v22 }
  0x57   :  { %388 = vmatpush3.bf16.msra.mxu1 %v425_v23 }
 0x113   :  { %v140_v31 = vpop.f32.mrb[0].mxu0 }
 0x114   :  { %v141_v32 = vadd.f32 %v140_v31, %v75_v29  ;;  %v142_v33 = vpop.f32.mrb[1].mxu0 }
 0x115   :  { %v143_v34 = vadd.f32 %v142_v33, %v79_v30  ;;  %v144_v35 = vpop.f32.mrb[2].mxu0 }
 0x116   :  { %v145_v36 = vadd.f32 %v144_v35, %v75_v29  ;;  %v146_v37 = vpop.f32.mrb[3].mxu0  ;;  %v149_v39 = vmax.f32 %v141_v32, 0.0 }
 0x117   :  { %v147_v38 = vadd.f32 %v146_v37, %v79_v30  ;;  %v150_v41 = vmax.f32 %v143_v34, 0.0 }
 0x118   :  { %v151_v40 = vmax.f32 %v145_v36, 0.0 }
 0x119   :  { %v152_v42 = vmax.f32 %v147_v38, 0.0 }
 0x11a   :  { %v153_v43 = vpack.c.bf16 %v151_v40, %v149_v39 }
 0x11b   :  { %v154_v44 = vpack.c.bf16 %v152_v42, %v150_v41 }
 0x11d   :  { %322 = vmatprep.mubr.bf16.mxu1 %v154_v44 }
 0x11e   :  { %323 = vmatmul.mubr.bf16.vlgmr.msra.gmra.mrb[0].mxu1 %v153_v43 }
 0x1f1   :  { %v389_v45 = vpop.f32.mrb[0].mxu1 }
 0x1f2   :  { %v390_v47 = vpop.f32.mrb[1].mxu1 }
 0x1f3   :  { %v391_v48 = vadd.f32 %v390_v47, %v389_v45  ;;  %v392_v49 = vpop.f32.mrb[2].mxu1 }
 0x1f4   :  { %v393_v50 = vpop.f32.mrb[3].mxu1 }
 0x1f5   :  { %v325_v51 = vadd.f32 %v391_v48, %v356_v46  ;;  %v394_v52 = vadd.f32 %v393_v50, %v392_v49 }
 0x1f7   :  { %331 = vst [vmem:[#allocation8] sm:$0xff] %v325_v51  ;;  %v328_v53 = vadd.f32 %v394_v52, %v356_v46 }
 0x1f9   :  { %332 = vst [vmem:[#allocation8 + $0x8] sm:$0xff] %v328_v53 }
 0x1fa   :  { %503 = shalt.err (!%p500_p0)
}
 0x1fb   :  { %s504_s14 = scalar_lea.hbm %s634_s5, 256 }
 0x1fc   :  { %p505_p1 = scmp.ne.s32.totalorder %s634_s5, %s504_s14  ;;  %p508_p2 = scmp.lt.u32.totalorder %s504_s14, %s634_s5 }
 0x1fe   :  { %p510_p3 = pnand %p508_p2, %p505_p1 }
 0x200   :  { %513 = shalt.err (!%p510_p3)
}
 0x201   :  { %344 = dma.vmem_to_hbm [thread:$0]  %s339_s11, 256, %s634_s5, [#allocation4], %s522_s30, %s522_s30, %s523_s6  }
 0x202   :  { %518 = dma.done.wait [#allocation4], 256  }
 0x203   :  { %519 = vsyncadd [#allocation4], 4294967040 }
 0x204   :  { %348 = vsyncpa [#allocation3], 1 }
 0x205   :  { %349 = vsyncpa [#allocation6], 1 }
 0x206   :  { %350 = vsyncpa [#allocation4], 1 }

</bundles_post_ra>
